<compile_context>
chip_gen: v6e
topology: v6e:2x2x1
jax: 0.10.0
libtpu: 0.0.40
codegen_flags: <defaults>
</compile_context>

<pallas_src>
import jax
import jax.numpy as jnp
from jax.experimental import pallas as pl
from jax.experimental.pallas import tpu as pltpu

HIGH = jax.lax.Precision.HIGHEST


def collapsed_mlp_kernel(x_ref, w_ref, b_ref, o_ref):
    # x: (TM, D) f32 streamed tile, w: (1, D) f32 resident row, b: (1,1) SMEM.
    # VPU broadcast-multiply + XLU lane-reduce (no MXU): a (TM,768)@(768,1)
    # f32 dot uses <1% of the MXU columns and can out-cost the x DMA on v5e.
    s = jnp.sum(x_ref[...] * w_ref[...], axis=-1, keepdims=True)   # (TM, 1)
    # Lane-dense store: transpose to (1, TM) on the otherwise-idle XLU so the
    # output write is an unmasked full-lane vst instead of 1/128-lane masked.
    o_ref[...] = jnp.transpose(s + b_ref[0, 0])                    # (1, TM)


def collapse_params(params):
    """Fold the activation-free Linear chain (Dropout = identity in eval) into
    a single lane-dense (1, D) weight row and a (1, 1) bias.  Exact algebra,
    done once outside the kernel's hot path."""
    w_all, b_all = params[0]
    for w, b in params[1:]:
        w_all = jnp.dot(w_all, w, precision=HIGH)
        b_all = jnp.dot(b_all, w, precision=HIGH) + b
    # (D, 1) -> (1, D): lane-dense row for the VPU multiply-reduce path.
    return jnp.transpose(w_all).astype(jnp.float32), b_all.astype(jnp.float32)


def mlp_forward(x, w_row, b_all, *, tm=1024):
    """x: (B, D) f32, w_row: (1, D) f32, b_all: (1, 1) f32 -> (B, 1) f32."""
    B, D = x.shape
    # TM=1024 amortizes the ~0.35us/step pipeline overhead (2*1024*D*4B = 6 MB
    # double-buffered x, inside the default scoped-VMEM limit on v5e/v6e/v7x).
    # For B <= tm a single full-extent block is always BlockSpec-legal.
    tm = B if B <= tm else tm
    out_row = pl.pallas_call(
        collapsed_mlp_kernel,
        out_shape=jax.ShapeDtypeStruct((1, B), jnp.float32),
        grid=(pl.cdiv(B, tm),),
        in_specs=[
            # Streamed batch tile of activations (double-buffered by Pallas).
            pl.BlockSpec((tm, D), lambda i: (i, 0)),
            # Collapsed weight row: same block every step -> resident in VMEM.
            pl.BlockSpec((1, D), lambda i: (0, 0)),
            # Scalar bias lives in SMEM (no padded VMEM tile / extra DMA).
            pl.BlockSpec(memory_space=pltpu.MemorySpace.SMEM),
        ],
        # Lane-dense output row; wrapper reshapes back to (B, 1).
        out_specs=pl.BlockSpec((1, tm), lambda i: (0, i)),
        compiler_params=pltpu.CompilerParams(
            dimension_semantics=("parallel",),
        ),
    )(x, w_row, b_all)
    return out_row.reshape(B, 1)


def make_params(key, input_size):
    """Deterministic synthetic weights, PyTorch-Linear-style uniform init.
    Returned layout is (in, out) = W_torch.T plus (1, out) bias."""
    dims = [input_size, 1024, 128, 64, 16, 1]
    params = []
    for i in range(len(dims) - 1):
        fan_in, fan_out = dims[i], dims[i + 1]
        key, kw, kb = jax.random.split(key, 3)
        bound = 1.0 / (fan_in ** 0.5)
        # PyTorch stores weight as (out, in); we use (in, out) = W.T
        w_torch = jax.random.uniform(kw, (fan_out, fan_in), jnp.float32,
                                     -bound, bound)
        b = jax.random.uniform(kb, (1, fan_out), jnp.float32, -bound, bound)
        params.append((jnp.transpose(w_torch), b))
    return params


def mlp_reference(x, params):
    """Layer-by-layer reference matching PyTorch eval() semantics
    (Dropout layers are identity at inference)."""
    h = x
    for w, b in params:
        h = jnp.dot(h, w, precision=HIGH) + b
    return h


if __name__ == "__main__":
    key = jax.random.PRNGKey(0)
    kx, kp = jax.random.split(key)

    batch = 8
    input_size = 768  # CLIP-embedding-sized input, as in the aesthetic scorer.

    x = jax.random.normal(kx, (batch, input_size), dtype=jnp.float32)
    params = make_params(kp, input_size)

    # One-time (amortized) algebraic fold of the five Linear layers.
    w_row, b_all = collapse_params(params)

    out = mlp_forward(x, w_row, b_all)
    out = jax.block_until_ready(out)

    ref = mlp_reference(x, params)
    assert out.shape == (batch, 1)
    assert jnp.allclose(out, ref, atol=5e-4, rtol=5e-4), "mismatch vs reference"

    print("KERNEL_OK")
</pallas_src>

<mosaic_0001>
module attributes {stable_mosaic.version = 11 : i64} {
  func.func @collapsed_mlp_kernel(%arg0: i32, %arg1: memref<8x768xf32, #tpu.memory_space<vmem>>, %arg2: memref<1x768xf32, #tpu.memory_space<vmem>>, %arg3: memref<1x1xf32, #tpu.memory_space<smem>>, %arg4: memref<1x8xf32, #tpu.memory_space<vmem>>) attributes {dimension_semantics = [#tpu.dimension_semantics<parallel>], iteration_bounds = array<i64: 1>, scalar_prefetch = 0 : i64, scratch_operands = 0 : i64, tpu.core_type = #tpu.core_type<tc>, window_params = [{transform_indices = @transform_0, window_bounds = array<i64: 8, 768>}, {pipeline_mode = #tpu.pipeline_mode<synchronous>, transform_indices = @transform_1, window_bounds = array<i64: 1, 768>}, {transform_indices = @transform_2, window_bounds = array<i64: 1, 1>}, {transform_indices = @transform_3, window_bounds = array<i64: 1, 8>}]} {
    %c0 = arith.constant 0 : index
    %c0_0 = arith.constant 0 : index
    %0 = vector.load %arg1[%c0, %c0_0] : memref<8x768xf32, #tpu.memory_space<vmem>>, vector<8x768xf32>
    %c0_1 = arith.constant 0 : index
    %c0_2 = arith.constant 0 : index
    %1 = vector.load %arg2[%c0_1, %c0_2] : memref<1x768xf32, #tpu.memory_space<vmem>>, vector<1x768xf32>
    %2 = vector.broadcast %1 : vector<1x768xf32> to vector<8x768xf32>
    %3 = arith.mulf %0, %2 : vector<8x768xf32>
    %cst = arith.constant dense<0.000000e+00> : vector<8xf32>
    %4 = vector.multi_reduction <add>, %3, %cst [1] : vector<8x768xf32> to vector<8xf32>
    %5 = vector.shape_cast %4 : vector<8xf32> to vector<8x1xf32>
    %c0_3 = arith.constant 0 : index
    %c0_4 = arith.constant 0 : index
    %6 = memref.load %arg3[%c0_3, %c0_4] : memref<1x1xf32, #tpu.memory_space<smem>>
    %7 = vector.broadcast %6 : f32 to vector<8x1xf32>
    %8 = arith.addf %5, %7 : vector<8x1xf32>
    %9 = tpu.transpose %8, [1, 0] : vector<8x1xf32> -> vector<1x8xf32>
    %c0_5 = arith.constant 0 : index
    %c0_6 = arith.constant 0 : index
    %10 = vector.load %arg4[%c0_5, %c0_6] : memref<1x8xf32, #tpu.memory_space<vmem>>, vector<1x8xf32>
    tpu.vector_store %arg4[%c0_5, %c0_6], %9 {strides = array<i32>} : memref<1x8xf32, #tpu.memory_space<vmem>>, vector<1x8xf32>,
    return
  }
  func.func @transform_0(%arg0: i32) -> (i32, i32) {
    %c0_i32 = arith.constant 0 : i32
    %c0_i32_0 = arith.constant 0 : i32
    return %arg0, %c0_i32 : i32, i32
  }
  func.func @transform_1(%arg0: i32) -> (i32, i32) {
    %c0_i32 = arith.constant 0 : i32
    %c0_i32_0 = arith.constant 0 : i32
    %c0_i32_1 = arith.constant 0 : i32
    return %c0_i32, %c0_i32_0 : i32, i32
  }
  func.func @transform_2(%arg0: i32) -> (i32, i32) {
    %c0_i32 = arith.constant 0 : i32
    %c0_i32_0 = arith.constant 0 : i32
    %c0_i32_1 = arith.constant 0 : i32
    return %c0_i32, %c0_i32_0 : i32, i32
  }
  func.func @transform_3(%arg0: i32) -> (i32, i32) {
    %c0_i32 = arith.constant 0 : i32
    %c0_i32_0 = arith.constant 0 : i32
    return %c0_i32, %arg0 : i32, i32
  }
}

</mosaic_0001>

<bundles_post_ra>
// kernel: tpu_custom_call.1
= control target key start
LH: loop header
LB: loop body
LE: loop exit
PB: predicated region body
PF: predicated region fallthrough
CT: control target
= control target key end

     0   :  { %9 = vsyncpa [#allocation4], 0  ;;  %s249_s0 = inlined_call_operand.hbm [shape: f32[8,768], index: 0, kind: input, shape index: {}]   ;;  %s250_s1 = inlined_call_operand.hbm [shape: f32[1,768], index: 1, kind: input, shape index: {}]   ;;  %s251_s2 = inlined_call_operand.<no memory space> [shape: f32[1,1], index: 2, kind: input, shape index: {}]   ;;  %s252_s3 = inlined_call_operand.hbm [shape: f32[1,8], index: 3, kind: output, shape index: {}]  }
   0x1   :  { %10 = vsyncpa [#allocation7], 0 }
   0x2   :  { %11 = vsyncpa [#allocation5], 0  ;;  %s214_s12 = smov [#allocation3]   ;;  %s215_s14 = smov [#allocation6]  }
   0x3   :  { %s18_s13 = sshll.u32 %s214_s12, 4  ;;  %s28_s15 = sshll.u32 %s215_s14, 4  ;;  %s19_s13 = int_to_ptr.vmem [resolvable:$true] %s18_s13  ;;  %s29_s15 = int_to_ptr.vmem [resolvable:$true] %s28_s15 }
   0x4   :  { %s156_s16 = scalar_lea.vmem %s19_s13, 768  ;;  %p161_p1 = scmp.lt.s32.totalorder %s19_s13, %s19_s13 }
   0x5   :  { %p157_p0 = scmp.ne.s32.totalorder %s19_s13, %s156_s16  ;;  %p162_p2 = scmp.lt.s32.totalorder %s156_s16, %s156_s16 }
   0x7   :  { %p163_p3 = por %p162_p2, %p161_p1 }
   0x9   :  { %p164_p4 = pnand %p163_p3, %p157_p0 }
   0xb   :  { %167 = shalt.err (!%p164_p4)
}
   0xc   :  { %21 = dma.hbm_to_vmem [thread:$0]  %s249_s0, 768, %s19_s13, [#allocation4]  }
   0xd   :  { %s176_s19 = scalar_lea.vmem %s29_s15, 96  ;;  %p181_p6 = scmp.lt.s32.totalorder %s29_s15, %s29_s15 }
   0xe   :  { %p177_p5 = scmp.ne.s32.totalorder %s29_s15, %s176_s19  ;;  %p182_p7 = scmp.lt.s32.totalorder %s176_s19, %s176_s19 }
  0x10   :  { %p183_p8 = por %p182_p7, %p181_p6 }
  0x12   :  { %p184_p9 = pnand %p183_p8, %p177_p5 }
  0x14   :  { %187 = shalt.err (!%p184_p9)
}
  0x15   :  { %31 = dma.hbm_to_vmem [thread:$0]  %s250_s1, 96, %s29_s15, [#allocation7]  }
  0x16   :  { %208 = dma.done.wait [#allocation4], 768  }
  0x17   :  { %209 = vsyncadd [#allocation4], 4294966528 }
  0x18   :  { %210 = dma.done.wait [#allocation7], 96  }
  0x19   :  { %211 = vsyncadd [#allocation7], 4294967200  ;;  %v48_v0 = vlaneseq  ;;  %v40_v6 = vld [vmem:[#allocation3] sm:$0xff]  ;;  %v41_v8 = vld [vmem:[#allocation3 + $0x8] sm:$0xff]  ;;  %v92_v32 = vstv %s251_s2  ;;  %s216_s22 = smov [#allocation8]   ;;  %vm126_vm0 = vcmask 57344  }
  0x1a   :  { %v42_v9 = vld [vmem:[#allocation3 + $0x10] sm:$0xff]  ;;  %v43_v16 = vld [vmem:[#allocation3 + $0x18] sm:$0xff]  ;;  %v44_v21 = vld [vmem:[#allocation3 + $0x20] sm:$0xff]  ;;  %s134_s23 = sshll.u32 %s216_s22, 4  ;;  %s135_s23 = int_to_ptr.vmem [resolvable:$true] %s134_s23 }
  0x1b   :  { %v49_v1 = vshrl.u32 %v48_v0, 7  ;;  %v46_v10 = vld [vmem:[#allocation6] sm:$0x3f]  ;;  %v45_v25 = vld [vmem:[#allocation3 + $0x28] sm:$0xff]  ;;  %s188_s24 = scalar_lea.vmem %s135_s23, 16  ;;  %s192_s25 = scalar_lea.vmem %s135_s23, 32 }
  0x1c   :  { %p189_p10 = scmp.ne.s32.totalorder %s135_s23, %s188_s24  ;;  %p193_p11 = scmp.lt.s32.totalorder %s135_s23, %s135_s23 }
  0x1d   :  { %v50_v2 = vsub.s32 0, %v49_v1  ;;  %v54_v3 = vsub.s32 1, %v49_v1  ;;  %v58_v4 = vsub.s32 2, %v49_v1  ;;  %v62_v5 = vsub.s32 3, %v49_v1  ;;  %p194_p12 = scmp.lt.s32.totalorder %s192_s25, %s188_s24 }
  0x1e   :  { %v66_v7 = vsub.s32 4, %v49_v1  ;;  %v70_v11 = vsub.s32 5, %v49_v1 }
  0x1f   :  { %v51_v12 = vrot.slane %v46_v10, %v50_v2  ;;  %v55_v13 = vrot.slane %v46_v10, %v54_v3  ;;  %v59_v14 = vrot.slane %v46_v10, %v58_v4  ;;  %v63_v15 = vrot.slane %v46_v10, %v62_v5  ;;  %p195_p13 = por %p194_p12, %p193_p11 }
  0x20   :  { %v67_v17 = vrot.slane %v46_v10, %v66_v7  ;;  %v71_v22 = vrot.slane %v46_v10, %v70_v11 }
  0x21   :  { %v78_v18 = vmul.f32 %v51_v12, %v40_v6  ;;  %v79_v19 = vmul.f32 %v55_v13, %v41_v8  ;;  %v80_v20 = vmul.f32 %v59_v14, %v42_v9  ;;  %v81_v23 = vmul.f32 %v63_v15, %v43_v16  ;;  %p196_p0 = pnand %p195_p13, %p189_p10 }
  0x22   :  { %v82_v26 = vmul.f32 %v67_v17, %v44_v21  ;;  %v83_v28 = vmul.f32 %v71_v22, %v45_v25 }
  0x23   :  { %v84_v24 = vadd.f32 %v79_v19, %v78_v18 }
  0x25   :  { %v85_v27 = vadd.f32 %v84_v24, %v80_v20 }
  0x27   :  { %v86_v29 = vadd.f32 %v85_v27, %v81_v23 }
  0x29   :  { %v87_v30 = vadd.f32 %v86_v29, %v82_v26 }
  0x2b   :  { %v88_v31 = vadd.f32 %v87_v30, %v83_v28 }
  0x2d   :  { %89 = vadd.xlane.f32.xlu0 %v88_v31 }
  0xb6   :  { %v90_v33 = vpop.xlane.xlu0 %89 }
  0xb7   :  { %v93_v34 = vadd.f32 %v92_v32, %v90_v33 }
  0xb9   :  { %94 = vxpose.xlu0.b32.start.end [1/1] (short) (narrow) %v93_v34, 8 }
 0x135   :  { %v110_v35 = vpop.trf.xlu0 }
 0x136   :  { %127 = vst.msk [vmem:[#allocation8] sm:$0x1] %vm126_vm0, %v110_v35 }
 0x137   :  { %199 = shalt.err (!%p196_p0)
}
 0x138   :  { %137 = dma.vmem_to_hbm [thread:$0]  %s135_s23, 16, %s252_s3, [#allocation5]  }
 0x139   :  { %212 = dma.done.wait [#allocation5], 16  }
 0x13a   :  { %213 = vsyncadd [#allocation5], 4294967280 }
 0x13b   :  { %141 = vsyncpa [#allocation4], 1 }
 0x13c   :  { %142 = vsyncpa [#allocation7], 1 }
 0x13d   :  { %143 = vsyncpa [#allocation5], 1 }

</bundles_post_ra>
